<compile_context>
chip_gen: v7x
topology: tpu7x:2x2x1
jax: 0.10.0
libtpu: 0.0.40
codegen_flags: <defaults>
</compile_context>

<pallas_src>
import jax
import jax.numpy as jnp
from jax.experimental import pallas as pl
from jax.experimental.pallas import tpu as pltpu


def _round_up(n: int, m: int) -> int:
    return pl.cdiv(n, m) * m


def _decoder_kernel(x_ref, w_ref, b_ref, o_ref):
    # SiLU computed in f32 (EUP sigmoid), then cast to the weight dtype so
    # the MXU sees matching native-precision operands.
    xf = x_ref[...].astype(jnp.float32)
    act = (xf * jax.nn.sigmoid(xf)).astype(w_ref.dtype)

    # Plain (TB, F) x (F, TD) contraction on the MXU, f32 accumulation.
    y = jnp.dot(act, w_ref[...], preferred_element_type=jnp.float32)
    y = y + b_ref[...].astype(jnp.float32)          # bias broadcast (1, TD)
    o_ref[...] = y.astype(o_ref.dtype)


def decoder_forward(x, weight, bias, *, block_b: int = 512, block_d: int = 1536,
                    mxu_dtype=None, force_pallas: bool = False):
    """SwitchTab Decoder forward: Linear(SiLU(x)).

    x:      (B, 2*hidden_dim)
    weight: (input_dim, 2*hidden_dim)   -- PyTorch nn.Linear layout
    bias:   (input_dim,)
    Returns (B, input_dim) in x.dtype.
    """
    B, F = x.shape
    D_out, F_w = weight.shape
    assert F_w == F, "weight feature dim must match x feature dim"
    assert bias.shape == (D_out,)

    # --- Small-problem bypass: at SwitchTab's actual sizes the whole op is a
    #     few KiB; fused XLA avoids kernel-launch / per-step overhead. ---
    total_bytes = (B * F + F * D_out + B * D_out) * x.dtype.itemsize
    if not force_pallas and total_bytes < (1 << 20):
        xf = x.astype(jnp.float32)
        act = xf * jax.nn.sigmoid(xf)
        y = act @ weight.astype(jnp.float32).T + bias.astype(jnp.float32)
        return y.astype(x.dtype)

    # One-time operand prep (weight is grid-resident, so this is free):
    # pre-transpose to (F, D_out) -> plain MK x KN contraction in the kernel.
    w_t = weight.T
    if mxu_dtype is not None:
        w_t = w_t.astype(mxu_dtype)   # explicit opt-in: activations follow this dtype
    b2 = bias.reshape(1, D_out)

    # --- Row tile: multiple of the sublane quantum; >=2 tiles when the batch
    #     allows so v7x can shard row tiles across its 2 TensorCores. ---
    mult = max(8, 32 // x.dtype.itemsize)           # f32:8  bf16:16  int8:32
    if B <= mult:
        TB = B                                       # full-dim block is legal
    else:
        TB = min(block_b, _round_up(pl.cdiv(B, 2), mult), _round_up(B, mult))
    num_b = pl.cdiv(B, TB)

    # --- Output-feature tile: whole weight stays VMEM-resident unless it is
    #     large; then tile D_out in 256-aligned blocks (MXU geometry). ---
    if D_out <= block_d:
        TD, num_d = D_out, 1                         # full-dim block is legal
    else:
        TD, num_d = block_d, pl.cdiv(D_out, block_d)

    # Grid-invariant operands don't need double-buffering.
    resident = {"pipeline_mode": pl.Buffered(1)} if num_d == 1 else {}

    # VMEM plan: double-buffered x/out tiles + (single|double)-buffered weight.
    w_bytes = w_t.dtype.itemsize
    need = (2 * TB * F * x.dtype.itemsize
            + 2 * TB * TD * x.dtype.itemsize
            + (1 if num_d == 1 else 2) * (F * TD * w_bytes + TD * bias.dtype.itemsize))
    vmem_limit = int(min(max(need * 3 // 2 + (2 << 20), 32 << 20), 112 << 20))

    return pl.pallas_call(
        _decoder_kernel,
        out_shape=jax.ShapeDtypeStruct((B, D_out), x.dtype),
        grid=(num_b, num_d),
        in_specs=[
            pl.BlockSpec((TB, F), lambda i, j: (i, 0)),               # x row tiles
            pl.BlockSpec((F, TD), lambda i, j: (0, j), **resident),   # weight^T
            pl.BlockSpec((1, TD), lambda i, j: (0, j), **resident),   # bias
        ],
        out_specs=pl.BlockSpec((TB, TD), lambda i, j: (i, j)),
        compiler_params=pltpu.CompilerParams(
            dimension_semantics=("parallel", "parallel"),
            vmem_limit_bytes=vmem_limit,
        ),
    )(x, w_t, b2)


def reference_forward(x, weight, bias):
    xf = x.astype(jnp.float32)
    act = xf * jax.nn.sigmoid(xf)
    y = act @ weight.astype(jnp.float32).T + bias.astype(jnp.float32)
    return y.astype(x.dtype)


if __name__ == "__main__":
    # SwitchTab Decoder(input_dim, hidden_dim): Linear(hidden_dim*2 -> input_dim)
    input_dim = 48
    hidden_dim = 32
    batch = 8

    key = jax.random.PRNGKey(0)
    kx, kw, kb = jax.random.split(key, 3)

    x = jax.random.normal(kx, (batch, hidden_dim * 2), dtype=jnp.float32)

    # Deterministic PyTorch-style init: uniform(-1/sqrt(fan_in), 1/sqrt(fan_in)).
    fan_in = hidden_dim * 2
    bound = 1.0 / (fan_in ** 0.5)
    weight = jax.random.uniform(kw, (input_dim, fan_in), jnp.float32,
                                minval=-bound, maxval=bound)
    bias = jax.random.uniform(kb, (input_dim,), jnp.float32,
                              minval=-bound, maxval=bound)

    ref = reference_forward(x, weight, bias)

    # 1) Pallas path exercised explicitly at the module's real (tiny) shape.
    out = jax.block_until_ready(decoder_forward(x, weight, bias, force_pallas=True))
    assert out.shape == (batch, input_dim)
    assert jnp.allclose(out, ref, atol=1e-5, rtol=1e-5), "Pallas path mismatch"

    # 2) Default entry point (small-problem bypass) matches too.
    out2 = jax.block_until_ready(decoder_forward(x, weight, bias))
    assert jnp.allclose(out2, ref, atol=1e-5, rtol=1e-5), "bypass path mismatch"

    # 3) Larger config exercising a ragged last row tile and a 2-step parallel grid.
    B2, D2, H2 = 300, 256, 96
    x2 = jax.random.normal(kx, (B2, H2 * 2), dtype=jnp.float32)
    w2 = jax.random.uniform(kw, (D2, H2 * 2), jnp.float32, minval=-0.1, maxval=0.1)
    b2 = jax.random.uniform(kb, (D2,), jnp.float32, minval=-0.1, maxval=0.1)
    out3 = jax.block_until_ready(decoder_forward(x2, w2, b2, force_pallas=True))
    ref3 = reference_forward(x2, w2, b2)
    assert out3.shape == (B2, D2)
    assert jnp.allclose(out3, ref3, atol=5e-2, rtol=5e-2), "large-config mismatch"

    print("KERNEL_OK")
</pallas_src>

<mosaic_0001>
module attributes {stable_mosaic.version = 11 : i64} {
  func.func @_decoder_kernel(%arg0: i32, %arg1: i32, %arg2: memref<8x64xf32, #tpu.memory_space<vmem>>, %arg3: memref<64x48xf32, #tpu.memory_space<vmem>>, %arg4: memref<1x48xf32, #tpu.memory_space<vmem>>, %arg5: memref<8x48xf32, #tpu.memory_space<vmem>>) attributes {dimension_semantics = [#tpu.dimension_semantics<parallel>, #tpu.dimension_semantics<parallel>], iteration_bounds = array<i64: 1, 1>, scalar_prefetch = 0 : i64, scratch_operands = 0 : i64, tpu.core_type = #tpu.core_type<tc>, window_params = [{transform_indices = @transform_0, window_bounds = array<i64: 8, 64>}, {pipeline_mode = #tpu.pipeline_mode<synchronous>, transform_indices = @transform_1, window_bounds = array<i64: 64, 48>}, {pipeline_mode = #tpu.pipeline_mode<synchronous>, transform_indices = @transform_2, window_bounds = array<i64: 1, 48>}, {transform_indices = @transform_3, window_bounds = array<i64: 8, 48>}]} {
    %c0 = arith.constant 0 : index
    %c0_0 = arith.constant 0 : index
    %0 = vector.load %arg2[%c0, %c0_0] : memref<8x64xf32, #tpu.memory_space<vmem>>, vector<8x64xf32>
    %1 = arith.negf %0 : vector<8x64xf32>
    %2 = math.exp %1 : vector<8x64xf32>
    %cst = arith.constant 1.000000e+00 : f32
    %3 = vector.broadcast %cst : f32 to vector<8x64xf32>
    %4 = arith.addf %3, %2 : vector<8x64xf32>
    %5 = arith.divf %3, %4 : vector<8x64xf32>
    %6 = arith.mulf %0, %5 : vector<8x64xf32>
    %c0_1 = arith.constant 0 : index
    %c0_2 = arith.constant 0 : index
    %7 = vector.load %arg3[%c0_1, %c0_2] : memref<64x48xf32, #tpu.memory_space<vmem>>, vector<64x48xf32>
    %cst_3 = arith.constant dense<0.000000e+00> : vector<8x48xf32>
    %8 = tpu.matmul %6, %7, %cst_3 {dimension_numbers = #tpu.dot_dimension_numbers<[1], [0], [0], [1], [0, 0, 1, 1], [], []>} : vector<8x64xf32>, vector<64x48xf32>, vector<8x48xf32> -> vector<8x48xf32>
    %c0_4 = arith.constant 0 : index
    %c0_5 = arith.constant 0 : index
    %9 = vector.load %arg4[%c0_4, %c0_5] : memref<1x48xf32, #tpu.memory_space<vmem>>, vector<1x48xf32>
    %10 = vector.broadcast %9 : vector<1x48xf32> to vector<8x48xf32>
    %11 = arith.addf %8, %10 : vector<8x48xf32>
    %c0_6 = arith.constant 0 : index
    %c0_7 = arith.constant 0 : index
    %12 = vector.load %arg5[%c0_6, %c0_7] : memref<8x48xf32, #tpu.memory_space<vmem>>, vector<8x48xf32>
    tpu.vector_store %arg5[%c0_6, %c0_7], %11 {strides = array<i32>} : memref<8x48xf32, #tpu.memory_space<vmem>>, vector<8x48xf32>,
    return
  }
  func.func @transform_0(%arg0: i32, %arg1: i32) -> (i32, i32) {
    %c0_i32 = arith.constant 0 : i32
    %c0_i32_0 = arith.constant 0 : i32
    return %arg0, %c0_i32 : i32, i32
  }
  func.func @transform_1(%arg0: i32, %arg1: i32) -> (i32, i32) {
    %c0_i32 = arith.constant 0 : i32
    %c0_i32_0 = arith.constant 0 : i32
    return %c0_i32, %arg1 : i32, i32
  }
  func.func @transform_2(%arg0: i32, %arg1: i32) -> (i32, i32) {
    %c0_i32 = arith.constant 0 : i32
    %c0_i32_0 = arith.constant 0 : i32
    return %c0_i32, %arg1 : i32, i32
  }
  func.func @transform_3(%arg0: i32, %arg1: i32) -> (i32, i32) {
    %c0_i32 = arith.constant 0 : i32
    return %arg0, %arg1 : i32, i32
  }
}

</mosaic_0001>

<bundles_post_ra>
// kernel: tpu_custom_call.1
= control target key start
LH: loop header
LB: loop body
LE: loop exit
PB: predicated region body
PF: predicated region fallthrough
CT: control target
= control target key end

     0   :  { %v203_v3 = vmov 0.0|0.0   ;;  %vm204_vm0 = vmmov 0   ;;  %v205_v6 = vmov 0.0   ;;  %s269_s0 = inlined_call_operand.vmem [shape: f32[8,64], index: 0, kind: input, shape index: {}]   ;;  %s270_s1 = inlined_call_operand.vmem [shape: f32[64,48], index: 1, kind: input, shape index: {}]   ;;  %s271_s2 = inlined_call_operand.vmem [shape: f32[1,48], index: 2, kind: input, shape index: {}]   ;;  %s272_s3 = inlined_call_operand.hbm [shape: f32[8,48], index: 3, kind: output, shape index: {}]  }
   0x1   :  { %v23_v0 = vld [vmem:[%s270_s1] sm:$0xff]  ;;  %v24_v1 = vld [vmem:[%s270_s1 + $0x8] sm:$0xff]  ;;  %v25_v2 = vld [vmem:[%s270_s1 + $0x10] sm:$0xff]  ;;  %159 = vmatprep.subr.bf16.mxu0 %v203_v3  ;;  %156 = vmatprep.mubr.msk.f32.mxu0 %vm204_vm0, %v205_v6 }
   0x2   :  { %v160_v4 = vpack.c.bf16 %v24_v1, %v23_v0  ;;  %v26_v5 = vld [vmem:[%s270_s1 + $0x18] sm:$0xff]  ;;  %v15_v7 = vld [vmem:[%s269_s0] sm:$0xff] }
   0x3   :  { %v163_v8 = vpack.c.bf16 %v26_v5, %v25_v2  ;;  %v128_v9 = vmul.f32 -1.442695, %v15_v7 }
   0x4   :  { %161 = vmatpush3.bf16.msra.mxu0 %v160_v4 }
   0x5   :  { %8 = vsyncpa [#allocation3], 0  ;;  %162 = vmatprep.subr.bf16.mxu0 %v203_v3  ;;  %v27_v10 = vld [vmem:[%s270_s1 + $0x20] sm:$0xff]  ;;  %v28_v11 = vld [vmem:[%s270_s1 + $0x28] sm:$0xff]  ;;  %175 = vpow2.f32 %v128_v9  ;;  %vm38_vm1 = vcmask 523264   ;;  %s206_s4 = smov [#allocation2]  }
   0x6   :  { %v166_v12 = vpack.c.bf16 %v28_v11, %v27_v10  ;;  %v29_v13 = vld [vmem:[%s270_s1 + $0x30] sm:$0xff]  ;;  %v30_v14 = vld [vmem:[%s270_s1 + $0x38] sm:$0xff]  ;;  %v129_v20 = vld [vmem:[%s271_s2] ss:$0 sm:$0xff]  ;;  %s120_s5 = sshll.u32 %s206_s4, 4  ;;  %vm112_vm2 = vcmask 392192   ;;  %s121_s5 = int_to_ptr.vmem [resolvable:$true] %s120_s5 }
   0x7   :  { %v169_v15 = vpack.c.bf16 %v30_v14, %v29_v13  ;;  %s179_s1 = scalar_lea.vmem %s121_s5, 128  ;;  %p184_p1 = scmp.lt.s32.totalorder %s121_s5, %s121_s5 }
   0x8   :  { %164 = vmatpush3.bf16.msra.mxu0 %v163_v8  ;;  %p180_p0 = scmp.ne.s32.totalorder %s121_s5, %s179_s1  ;;  %p185_p2 = scmp.lt.s32.totalorder %s179_s1, %s179_s1 }
   0x9   :  { %165 = vmatprep.subr.bf16.mxu0 %v203_v3 }
   0xa   :  { %p186_p3 = por %p185_p2, %p184_p1 }
   0xc   :  { %167 = vmatpush3.bf16.msra.mxu0 %v166_v12  ;;  %p187_p4 = pnand %p186_p3, %p180_p0 }
   0xd   :  { %168 = vmatprep.subr.bf16.mxu0 %v203_v3 }
   0xf   :  { %v176_v16 = vpop.eup %175 }
  0x10   :  { %170 = vmatpush3.bf16.msra.mxu0 %v169_v15  ;;  %v19_v17 = vadd.f32 1.0, %v176_v16 }
  0x12   :  { %177 = vrcp.f32 %v19_v17 }
  0x1c   :  { %v178_v18 = vpop.eup %177 }
  0x1d   :  { %v22_v19 = vmul.f32 %v178_v18, %v15_v7 }
  0x1f   :  { %157 = vmatmul.mubr.msk.f32.vlgmr.msra.gmra.mrb[0].mxu0 %vm38_vm1, %v22_v19 }
  0xf2   :  { %v108_v21 = vpop.f32.mrb[0].mxu0 }
  0xf3   :  { %v109_v22 = vadd.f32 %v129_v20, %v108_v21  ;;  %v158_v23 = vpop.f32.mrb[1].mxu0 }
  0xf5   :  { %113 = vst.msk [vmem:[#allocation2] sm:$0xff] %vm112_vm2, %v109_v22 }
  0xf6   :  { %190 = shalt.err (!%p187_p4)
}
  0xf7   :  { %s191_s8 = scalar_lea.hbm %s272_s3, 128 }
  0xf8   :  { %p192_p5 = scmp.ne.s32.totalorder %s272_s3, %s191_s8  ;;  %p195_p6 = scmp.lt.u32.totalorder %s191_s8, %s272_s3 }
  0xfa   :  { %p197_p7 = pnand %p195_p6, %p192_p5 }
  0xfc   :  { %200 = shalt.err (!%p197_p7)
}
  0xfd   :  { %123 = dma.vmem_to_hbm [thread:$0]  %s121_s5, 128, %s272_s3, [#allocation3]  }
  0xfe   :  { %201 = dma.done.wait [#allocation3], 128  }
  0xff   :  { %202 = vsyncadd [#allocation3], 4294967168 }
 0x100   :  { %127 = vsyncpa [#allocation3], 1 }

</bundles_post_ra>
